<compile_context>
chip_gen: v6e
topology: v6e:2x2x1
jax: 0.10.0
libtpu: 0.0.40
codegen_flags: <defaults>
</compile_context>

<pallas_src>
import functools

import jax
import jax.numpy as jnp
from jax import lax
from jax.experimental import pallas as pl
from jax.experimental.pallas import tpu as pltpu


def _round_up(x: int, m: int) -> int:
    return (x + m - 1) // m * m


def _cdiv(a: int, b: int) -> int:
    return -(-a // b)


def _vmem_capacity_bytes() -> int:
    try:
        cap = getattr(pltpu.get_tpu_info(), "vmem_capacity_bytes", None)
        if cap:
            return int(cap)
    except Exception:
        pass
    return 64 * 1024 * 1024  # conservative (v7x physical)


def _cbbce_kernel(yp_ref, yt_ref, out_ref, acc_ref, *,
                  weight1, n_rows, n_cols, gf_inner,
                  need_row_mask, need_col_mask):
    """Weighted BCE-with-logits accumulated over feature tiles.

    Grid = (row_blocks [parallel], feat_chunks [parallel], feat_tiles
    [arbitrary/reduction]). acc_ref is a (tb, 128) f32 accumulator; lanes are
    folded per step, sublanes in the epilogue -> one (8, 128) lane-dense
    partial per (row_block, feat_chunk).
    """
    i = pl.program_id(0)
    jo = pl.program_id(1)
    ji = pl.program_id(2)
    tb, tf = yp_ref.shape

    @pl.when(ji == 0)
    def _():
        acc_ref[...] = jnp.zeros_like(acc_ref)

    x = yp_ref[...].astype(jnp.float32)
    y = yt_ref[...].astype(jnp.float32)

    # Numerically stable BCE with logits: max(x,0) - x*y + log(1 + exp(-|x|)).
    nll = jnp.maximum(x, 0.0) - x * y + jnp.log1p(jnp.exp(-jnp.abs(x)))
    # Class-balancing: weight1 on positives (y >= 0.9999), 1 on negatives.
    contrib = nll * jnp.where(y >= 0.9999, jnp.float32(weight1), jnp.float32(1.0))

    # Ragged-edge / phantom-tile mask: a single select zeroes any contribution
    # (including OOB garbage) from rows >= n_rows or cols >= n_cols. Only
    # emitted when the static shape actually needs it.
    valid = None
    if need_row_mask:
        rows = i * tb + lax.broadcasted_iota(jnp.int32, (tb, tf), 0)
        valid = rows < n_rows
    if need_col_mask:
        cols = (jo * gf_inner + ji) * tf + lax.broadcasted_iota(jnp.int32, (tb, tf), 1)
        cmask = cols < n_cols
        valid = cmask if valid is None else jnp.logical_and(valid, cmask)
    if valid is not None:
        contrib = jnp.where(valid, contrib, jnp.float32(0.0))

    # Fold lanes (tb, tf) -> (tb, 128) with static, layout-aligned slice adds,
    # then accumulate. Keeps the resident accumulator (and its per-step VMEM
    # read-modify-write) at (tb, 128) instead of the full tile.
    folded = contrib[:, 0:128]
    for c in range(1, tf // 128):
        folded = folded + contrib[:, c * 128:(c + 1) * 128]
    acc_ref[...] += folded

    @pl.when(ji == pl.num_programs(2) - 1)
    def _():
        # Fold sublanes (tb, 128) -> (8, 128) and emit the partial.
        acc = acc_ref[...]
        part = acc[0:8, :]
        for r in range(1, tb // 8):
            part = part + acc[r * 8:(r + 1) * 8, :]
        out_ref[...] = part


def cbbce_loss(y_pred: jax.Array, y_true: jax.Array,
               ratio: float, beta: float = 0.99, *,
               tile_budget_elems: int | None = None) -> jax.Array:
    """Class-balanced BCE-with-logits loss (mean). y_pred/y_true: [B, F].

    y_true may be any float/int/bool dtype holding {0, 1}; narrow dtypes
    (int8/bf16) reduce HBM traffic and are cast to f32 inside the kernel.
    """
    assert y_pred.shape == y_true.shape and y_pred.ndim == 2
    weight1 = (1.0 - beta) / (1.0 - beta ** ratio)
    B, F = y_pred.shape

    # Generation-aware scoped-VMEM request: 64 MiB on v5e/v6e (128 MiB
    # physical), ~44 MiB on v7x (64 MiB physical).
    vmem_limit = min(64 * 1024 * 1024, int(_vmem_capacity_bytes() * 0.7))

    # Sublane packing alignment: 4-byte -> 8, 2-byte -> 16, 1-byte -> 32.
    min_item = min(y_pred.dtype.itemsize, y_true.dtype.itemsize)
    row_align = {1: 32, 2: 16}.get(min_item, 8)

    # Per-input tile budget ~1M elements (~4 MiB f32): big enough to amortize
    # the ~0.35 us/step overhead regardless of tb, small enough that the
    # double-buffered pipeline footprint stays well inside every generation's
    # VMEM (<= ~20 MiB resident).
    if tile_budget_elems is None:
        tile_budget_elems = 1 << 20
    tb = min(_round_up(B, row_align), 256)
    tf = max(128, (tile_budget_elems // tb) // 128 * 128)
    tf = min(tf, _round_up(F, 128))

    gb = _cdiv(B, tb)
    nft = _cdiv(F, tf)
    # v7x megacore: if there is only one row block, split the feature axis into
    # two parallel chunks so both TensorCores get work. Free on v5e/v6e (1 TC).
    gf_outer = 2 if (gb == 1 and nft >= 2) else 1
    gf_inner = _cdiv(nft, gf_outer)

    need_row_mask = (gb * tb != B)
    need_col_mask = (gf_outer * gf_inner * tf != F)

    kernel = functools.partial(
        _cbbce_kernel, weight1=float(weight1), n_rows=B, n_cols=F,
        gf_inner=gf_inner, need_row_mask=need_row_mask,
        need_col_mask=need_col_mask)

    def in_index_map(i, jo, ji):
        # Clamp phantom feature tiles (odd tile count split in two); their
        # contribution is zeroed in-kernel by the column mask.
        return (i, jnp.minimum(jo * gf_inner + ji, nft - 1))

    partials = pl.pallas_call(
        kernel,
        out_shape=jax.ShapeDtypeStruct((gb * 8, gf_outer * 128), jnp.float32),
        grid_spec=pltpu.PrefetchScalarGridSpec(
            num_scalar_prefetch=0,
            grid=(gb, gf_outer, gf_inner),
            in_specs=[
                pl.BlockSpec((tb, tf), in_index_map),
                pl.BlockSpec((tb, tf), in_index_map),
            ],
            out_specs=pl.BlockSpec((8, 128), lambda i, jo, ji: (i, jo)),
            scratch_shapes=[pltpu.VMEM((tb, 128), jnp.float32)],
        ),
        compiler_params=pltpu.CompilerParams(
            dimension_semantics=("parallel", "parallel", "arbitrary"),
            vmem_limit_bytes=vmem_limit,
        ),
    )(y_pred, y_true)

    return jnp.sum(partials) / jnp.float32(B * F)


def _reference_loss(y_pred, y_true, ratio, beta=0.99):
    """Pure-JAX reference (mirrors the PyTorch forward)."""
    weight1 = (1.0 - beta) / (1.0 - beta ** ratio)
    x = y_pred.astype(jnp.float32)
    y = y_true.astype(jnp.float32)
    nll = jnp.maximum(x, 0.0) - x * y + jnp.log1p(jnp.exp(-jnp.abs(x)))
    nll = jnp.where(y >= 0.9999, weight1 * nll, nll)
    return jnp.mean(nll)


if __name__ == "__main__":
    ratio, beta = 0.25, 0.99
    key = jax.random.PRNGKey(0)
    k1, k2, k3, k4, k5, k6 = jax.random.split(key, 6)

    # Shapes consistent with the module's [B, N*K] inputs: B=2, N=8, K=32.
    B, N, K = 2, 8, 32
    F = N * K
    y_pred = jax.random.normal(k1, (B, F), dtype=jnp.float32)
    # Binary targets in int8: consumed directly (no conversion pass), cuts
    # the target HBM stream 4x vs f32.
    y_true = (jax.random.uniform(k2, (B, F)) < ratio).astype(jnp.int8)
    loss = jax.block_until_ready(cbbce_loss(y_pred, y_true, ratio=ratio, beta=beta))
    ref = _reference_loss(y_pred, y_true, ratio=ratio, beta=beta)
    assert jnp.allclose(loss, ref, rtol=1e-5, atol=1e-6), (loss, ref)

    # Ragged shapes with float targets: exercises row + lane masking (no pad).
    B2, F2 = 3, 200
    y_pred2 = jax.random.normal(k3, (B2, F2), dtype=jnp.float32)
    y_true2 = (jax.random.uniform(k4, (B2, F2)) < ratio).astype(jnp.float32)
    loss2 = jax.block_until_ready(cbbce_loss(y_pred2, y_true2, ratio=ratio, beta=beta))
    ref2 = _reference_loss(y_pred2, y_true2, ratio=ratio, beta=beta)
    assert jnp.allclose(loss2, ref2, rtol=1e-5, atol=1e-6), (loss2, ref2)

    # Tiny tile budget to exercise the 3-D grid (feature split across both
    # v7x TensorCores), the phantom-tile clamp (odd tile count) and both masks.
    B3, F3 = 5, 300
    y_pred3 = jax.random.normal(k5, (B3, F3), dtype=jnp.float32)
    y_true3 = (jax.random.uniform(k6, (B3, F3)) < ratio).astype(jnp.float32)
    loss3 = jax.block_until_ready(
        cbbce_loss(y_pred3, y_true3, ratio=ratio, beta=beta,
                   tile_budget_elems=8 * 128))
    ref3 = _reference_loss(y_pred3, y_true3, ratio=ratio, beta=beta)
    assert jnp.allclose(loss3, ref3, rtol=1e-5, atol=1e-6), (loss3, ref3)

    print("KERNEL_OK")
</pallas_src>

<mosaic_0001>
module attributes {stable_mosaic.version = 11 : i64} {
  func.func @_cbbce_kernel(%arg0: i32, %arg1: i32, %arg2: i32, %arg3: memref<32x256xf32, #tpu.memory_space<vmem>>, %arg4: memref<32x256xi8, #tpu.memory_space<vmem>>, %arg5: memref<8x128xf32, #tpu.memory_space<vmem>>, %arg6: memref<32x128xf32, #tpu.memory_space<vmem>>) attributes {dimension_semantics = [#tpu.dimension_semantics<parallel>, #tpu.dimension_semantics<parallel>, #tpu.dimension_semantics<arbitrary>], iteration_bounds = array<i64: 1, 1, 1>, scalar_prefetch = 0 : i64, scratch_operands = 1 : i64, tpu.core_type = #tpu.core_type<tc>, window_params = [{transform_indices = @transform_0, window_bounds = array<i64: 32, 256>}, {transform_indices = @transform_1, window_bounds = array<i64: 32, 256>}, {transform_indices = @transform_2, window_bounds = array<i64: 8, 128>}]} {
    %c0_i32 = arith.constant 0 : i32
    %0 = arith.cmpi eq, %arg2, %c0_i32 : i32
    %1 = arith.extui %0 : i1 to i32
    %c0_i32_0 = arith.constant 0 : i32
    %2 = arith.cmpi ne, %1, %c0_i32_0 : i32
    scf.if %2 {
      %cst_15 = arith.constant 0.000000e+00 : f32
      %39 = vector.broadcast %cst_15 : f32 to vector<32x128xf32>
      %c0_16 = arith.constant 0 : index
      %c0_17 = arith.constant 0 : index
      %40 = vector.load %arg6[%c0_16, %c0_17] : memref<32x128xf32, #tpu.memory_space<vmem>>, vector<32x128xf32>
      tpu.vector_store %arg6[%c0_16, %c0_17], %39 {strides = array<i32>} : memref<32x128xf32, #tpu.memory_space<vmem>>, vector<32x128xf32>,
    } else {
    }
    %c0 = arith.constant 0 : index
    %c0_1 = arith.constant 0 : index
    %3 = vector.load %arg3[%c0, %c0_1] : memref<32x256xf32, #tpu.memory_space<vmem>>, vector<32x256xf32>
    %c0_2 = arith.constant 0 : index
    %c0_3 = arith.constant 0 : index
    %4 = vector.load %arg4[%c0_2, %c0_3] : memref<32x256xi8, #tpu.memory_space<vmem>>, vector<32x256xi8>
    %5 = arith.sitofp %4 : vector<32x256xi8> to vector<32x256xf32>
    %cst = arith.constant 0.000000e+00 : f32
    %6 = vector.broadcast %cst : f32 to vector<32x256xf32>
    %7 = arith.maximumf %3, %6 : vector<32x256xf32>
    %8 = arith.mulf %3, %5 : vector<32x256xf32>
    %9 = arith.subf %7, %8 : vector<32x256xf32>
    %10 = math.absf %3 : vector<32x256xf32>
    %cst_4 = arith.constant 0.000000e+00 : f32
    %11 = vector.broadcast %cst_4 : f32 to vector<32x256xf32>
    %12 = arith.subf %11, %10 : vector<32x256xf32>
    %13 = math.exp %12 : vector<32x256xf32>
    %14 = math.log1p %13 : vector<32x256xf32>
    %15 = arith.addf %9, %14 : vector<32x256xf32>
    %cst_5 = arith.constant 0.999899983 : f32
    %16 = vector.broadcast %cst_5 : f32 to vector<32x256xf32>
    %17 = arith.cmpf oge, %5, %16 : vector<32x256xf32>
    %cst_6 = arith.constant 3.98496866 : f32
    %cst_7 = arith.constant 1.000000e+00 : f32
    %18 = vector.broadcast %cst_6 : f32 to vector<32x256xf32>
    %19 = vector.broadcast %cst_7 : f32 to vector<32x256xf32>
    %20 = arith.select %17, %18, %19 : vector<32x256xi1>, vector<32x256xf32>
    %21 = arith.mulf %15, %20 : vector<32x256xf32>
    %c32_i32 = arith.constant 32 : i32
    %22 = arith.muli %arg0, %c32_i32 : i32
    %23 = tpu.iota {dimensions = array<i32: 0>} : vector<32x256xi32>
    %24 = vector.broadcast %22 : i32 to vector<32x256xi32>
    %25 = arith.addi %24, %23 : vector<32x256xi32>
    %c2_i32 = arith.constant 2 : i32
    %26 = vector.broadcast %c2_i32 : i32 to vector<32x256xi32>
    %27 = arith.cmpi slt, %25, %26 : vector<32x256xi32>
    %cst_8 = arith.constant 0.000000e+00 : f32
    %28 = vector.broadcast %cst_8 : f32 to vector<32x256xf32>
    %29 = arith.select %27, %21, %28 : vector<32x256xi1>, vector<32x256xf32>
    %30 = vector.extract_strided_slice %29 {offsets = [0, 0], sizes = [32, 128], strides = [1, 1]} : vector<32x256xf32> to vector<32x128xf32>
    %31 = vector.extract_strided_slice %29 {offsets = [0, 128], sizes = [32, 128], strides = [1, 1]} : vector<32x256xf32> to vector<32x128xf32>
    %32 = arith.addf %30, %31 : vector<32x128xf32>
    %c0_9 = arith.constant 0 : index
    %c0_10 = arith.constant 0 : index
    %33 = vector.load %arg6[%c0_9, %c0_10] : memref<32x128xf32, #tpu.memory_space<vmem>>, vector<32x128xf32>
    %34 = arith.addf %33, %32 : vector<32x128xf32>
    %c0_11 = arith.constant 0 : index
    %c0_12 = arith.constant 0 : index
    %35 = vector.load %arg6[%c0_11, %c0_12] : memref<32x128xf32, #tpu.memory_space<vmem>>, vector<32x128xf32>
    tpu.vector_store %arg6[%c0_11, %c0_12], %34 {strides = array<i32>} : memref<32x128xf32, #tpu.memory_space<vmem>>, vector<32x128xf32>,
    %c0_i32_13 = arith.constant 0 : i32
    %36 = arith.cmpi eq, %arg2, %c0_i32_13 : i32
    %37 = arith.extui %36 : i1 to i32
    %c0_i32_14 = arith.constant 0 : i32
    %38 = arith.cmpi ne, %37, %c0_i32_14 : i32
    scf.if %38 {
      %c0_15 = arith.constant 0 : index
      %c0_16 = arith.constant 0 : index
      %39 = vector.load %arg6[%c0_15, %c0_16] : memref<32x128xf32, #tpu.memory_space<vmem>>, vector<32x128xf32>
      %40 = vector.extract_strided_slice %39 {offsets = [0, 0], sizes = [8, 128], strides = [1, 1]} : vector<32x128xf32> to vector<8x128xf32>
      %41 = vector.extract_strided_slice %39 {offsets = [8, 0], sizes = [8, 128], strides = [1, 1]} : vector<32x128xf32> to vector<8x128xf32>
      %42 = arith.addf %40, %41 : vector<8x128xf32>
      %43 = vector.extract_strided_slice %39 {offsets = [16, 0], sizes = [8, 128], strides = [1, 1]} : vector<32x128xf32> to vector<8x128xf32>
      %44 = arith.addf %42, %43 : vector<8x128xf32>
      %45 = vector.extract_strided_slice %39 {offsets = [24, 0], sizes = [8, 128], strides = [1, 1]} : vector<32x128xf32> to vector<8x128xf32>
      %46 = arith.addf %44, %45 : vector<8x128xf32>
      %c0_17 = arith.constant 0 : index
      %c0_18 = arith.constant 0 : index
      %47 = vector.load %arg5[%c0_17, %c0_18] : memref<8x128xf32, #tpu.memory_space<vmem>>, vector<8x128xf32>
      tpu.vector_store %arg5[%c0_17, %c0_18], %46 {strides = array<i32>} : memref<8x128xf32, #tpu.memory_space<vmem>>, vector<8x128xf32>,
    } else {
    }
    return
  }
  func.func @transform_0(%arg0: i32, %arg1: i32, %arg2: i32) -> (i32, i32) {
    %c1_i32 = arith.constant 1 : i32
    %0 = arith.muli %arg1, %c1_i32 : i32
    %1 = arith.addi %0, %arg2 : i32
    %c0_i32 = arith.constant 0 : i32
    %2 = arith.minsi %1, %c0_i32 : i32
    %c0_i32_0 = arith.constant 0 : i32
    return %arg0, %2 : i32, i32
  }
  func.func @transform_1(%arg0: i32, %arg1: i32, %arg2: i32) -> (i32, i32) {
    %c1_i32 = arith.constant 1 : i32
    %0 = arith.muli %arg1, %c1_i32 : i32
    %1 = arith.addi %0, %arg2 : i32
    %c0_i32 = arith.constant 0 : i32
    %2 = arith.minsi %1, %c0_i32 : i32
    %c0_i32_0 = arith.constant 0 : i32
    return %arg0, %2 : i32, i32
  }
  func.func @transform_2(%arg0: i32, %arg1: i32, %arg2: i32) -> (i32, i32) {
    %c0_i32 = arith.constant 0 : i32
    return %arg0, %arg1 : i32, i32
  }
}

</mosaic_0001>

<bundles_post_ra>
// kernel: tpu_custom_call.1
= control target key start
LH: loop header
LB: loop body
LE: loop exit
PB: predicated region body
PF: predicated region fallthrough
CT: control target
= control target key end

     0   :  { %7 = vsyncpa [#allocation4], 0  ;;  %s926_s0 = inlined_call_operand.hbm [shape: f32[2,256], index: 0, kind: input, shape index: {}]   ;;  %s927_s1 = inlined_call_operand.hbm [shape: s8[2,256], index: 1, kind: input, shape index: {}]   ;;  %s928_s2 = inlined_call_operand.hbm [shape: f32[8,128], index: 2, kind: output, shape index: {}]  }
   0x1   :  { %8 = vsyncpa [#allocation7], 0 }
   0x2   :  { %9 = vsyncpa [#allocation5], 0 }
   0x3   :  { %18 = vsyncadd [#allocation4], 960  ;;  %s849_s9 = smov [#allocation3]  }
   0x4   :  { %s21_s10 = sshll.u32 %s849_s9, 4  ;;  %s22_s10 = int_to_ptr.vmem [resolvable:$true] %s21_s10 }
   0x5   :  { %s791_s11 = scalar_lea.vmem %s22_s10, 64  ;;  %s795_s12 = scalar_lea.vmem %s22_s10, 1024 }
   0x6   :  { %p792_p0 = scmp.ne.s32.totalorder %s22_s10, %s791_s11  ;;  %p796_p1 = scmp.lt.s32.totalorder %s22_s10, %s22_s10 }
   0x7   :  { %p797_p2 = scmp.lt.s32.totalorder %s795_s12, %s791_s11 }
   0x9   :  { %p798_p3 = por %p797_p2, %p796_p1 }
   0xb   :  { %p799_p4 = pnand %p798_p3, %p792_p0 }
   0xd   :  { %802 = shalt.err (!%p799_p4)
}
   0xe   :  { %s850_s13 = smov 64   ;;  %s851_s14 = smov 4  }
   0xf   :  { %27 = dma.hbm_to_vmem [thread:$0]  %s926_s0, 64, %s22_s10, [#allocation4], %s850_s13, %s850_s13, %s851_s14  }
  0x10   :  { %36 = vsyncadd [#allocation7], 224  ;;  %s852_s17 = smov [#allocation6]  }
  0x11   :  { %s39_s18 = sshll.u32 %s852_s17, 4  ;;  %s40_s18 = int_to_ptr.vmem [resolvable:$true] %s39_s18 }
  0x12   :  { %s811_s19 = scalar_lea.vmem %s40_s18, 32  ;;  %s815_s20 = scalar_lea.vmem %s40_s18, 256 }
  0x13   :  { %p812_p5 = scmp.ne.s32.totalorder %s40_s18, %s811_s19  ;;  %p816_p6 = scmp.lt.s32.totalorder %s40_s18, %s40_s18 }
  0x14   :  { %p817_p7 = scmp.lt.s32.totalorder %s815_s20, %s811_s19 }
  0x16   :  { %p818_p8 = por %p817_p7, %p816_p6 }
  0x18   :  { %p819_p9 = pnand %p818_p8, %p812_p5 }
  0x1a   :  { %822 = shalt.err (!%p819_p9)
}
  0x1b   :  { %s853_s21 = smov 32   ;;  %s854_s22 = smov 2  }
  0x1c   :  { %45 = dma.hbm_to_vmem [thread:$0]  %s927_s1, 32, %s40_s18, [#allocation7], %s853_s21, %s853_s21, %s854_s22  }
  0x1d   :  { %843 = dma.done.wait [#allocation4], 1024  }
  0x1e   :  { %844 = vsyncadd [#allocation4], 4294966272 }
  0x1f   :  { %845 = dma.done.wait [#allocation7], 256  }
  0x20   :  { %846 = vsyncadd [#allocation7], 4294967040  ;;  %v879_v0 = vld [vmem:[#allocation3] sm:$0xf]  ;;  %v881_v1 = vld [vmem:[#allocation3 + $0x4] sm:$0xf]  ;;  %v135_v18 = vlaneseq }
  0x21   :  { %v883_v2 = vld [vmem:[#allocation3 + $0x8] sm:$0xf]  ;;  %v885_v3 = vld [vmem:[#allocation3 + $0xc] sm:$0xf]  ;;  %v244_v4 = vand.u32 2147483647, %v879_v0 }
  0x22   :  { %v245_v5 = vand.u32 2147483647, %v881_v1  ;;  %v246_v6 = vand.u32 2147483647, %v883_v2  ;;  %v247_v7 = vand.u32 2147483647, %v885_v3 }
  0x23   :  { %v260_v8 = vsub.f32 0.0, %v244_v4  ;;  %v855_v16 = vmov 1983009808   ;;  %v755_v19 = vld [vmem:[#allocation6] sm:$0xf]   ;;  %v891_v22 = vshrl.u32 %v135_v18, 7 }
  0x24   :  { %v261_v9 = vsub.f32 0.0, %v245_v5  ;;  %v262_v10 = vsub.f32 0.0, %v246_v6  ;;  %v263_v11 = vsub.f32 0.0, %v247_v7  ;;  %v133_v17 = vunpack.c.l.s4 %v855_v16  ;;  %s857_s0 = smov [#allocation8]  }
  0x25   :  { %v276_v12 = vmul.f32 1.442695, %v260_v8  ;;  %v756_v20 = vunpack.c.0.s8 %v755_v19  ;;  %v757_v23 = vunpack.c.1.s8 %v755_v19  ;;  %v108_v42 = vmax.f32 %v879_v0, 0.0  ;;  %s740_s1 = sshll.u32 %s857_s0, 4  ;;  %s741_s1 = int_to_ptr.vmem [resolvable:$true] %s740_s1 }
  0x26   :  { %v278_v13 = vmul.f32 1.442695, %v261_v9  ;;  %v280_v14 = vmul.f32 1.442695, %v262_v10  ;;  %v282_v15 = vmul.f32 1.442695, %v263_v11  ;;  %v134_v21 = vunpack.c.0.s8 %v133_v17  ;;  %p828_p11 = scmp.lt.s32.totalorder %s741_s1, %s741_s1 }
  0x27   :  { %767 = vpow2.f32 %v276_v12  ;;  %v100_v25 = vcvt.s32.f32 %v756_v20  ;;  %v101_v29 = vcvt.s32.f32 %v757_v23  ;;  %v109_v43 = vmax.f32 %v881_v1, 0.0  ;;  %s823_s25 = scalar_lea.vmem %s741_s1, 128 }
  0x28   :  { %769 = vpow2.f32 %v278_v13  ;;  %v894_v26 = vsub.s32 %v134_v21, %v891_v22  ;;  %v110_v46 = vmax.f32 %v883_v2, 0.0  ;;  %v856_v52 = vmov 1.0   ;;  %p824_p10 = scmp.ne.s32.totalorder %s741_s1, %s823_s25  ;;  %p829_p12 = scmp.lt.s32.totalorder %s823_s25, %s823_s25 }
  0x29   :  { %771 = vpow2.f32 %v280_v14  ;;  %vm468_vm0 = vcmp.ge.f32.partialorder %v100_v25, 0.9999  ;;  %vm469_vm1 = vcmp.ge.f32.partialorder %v101_v29, 0.9999  ;;  %v111_v54 = vmax.f32 %v885_v3, 0.0 }
  0x2a   :  { %773 = vpow2.f32 %v282_v15  ;;  %v138_v34 = vrot.slane %v100_v25, %v894_v26  ;;  %v146_v36 = vrot.slane %v101_v29, %v894_v26  ;;  %v476_v53 = vsel %vm468_vm0, 3.9849687, %v856_v52  ;;  %p830_p13 = por %p829_p12, %p828_p11 }
  0x2b   :  { %v477_v61 = vsel %vm469_vm1, 3.9849687, %v856_v52  ;;  %vm599_vm6 = vcmp.lt.s32.totalorder %v891_v22, 2 }
  0x2c   :  { %v139_v38 = vcombine.high %v138_v34, %v138_v34  ;;  %v147_v40 = vcombine.high %v146_v36, %v146_v36  ;;  %v212_v47 = vmul.f32 %v138_v34, %v879_v0  ;;  %v214_v50 = vmul.f32 %v146_v36, %v883_v2  ;;  %p831_p0 = pnand %p830_p13, %p824_p10 }
  0x2d   :  { %v498_v2 = vrot.slane %v476_v53, %v894_v26  ;;  %v506_v11 = vrot.slane %v477_v61, %v894_v26 }
  0x2e   :  { %v213_v49 = vmul.f32 %v139_v38, %v881_v1  ;;  %v215_v55 = vmul.f32 %v147_v40, %v885_v3  ;;  %v228_v63 = vsub.f32 %v108_v42, %v212_v47  ;;  %v230_v5 = vsub.f32 %v110_v46, %v214_v50 }
  0x2f   :  { %v499_v19 = vcombine.high %v498_v2, %v498_v2  ;;  %v507_v25 = vcombine.high %v506_v11, %v506_v11 }
  0x30   :  { %v229_v4 = vsub.f32 %v109_v43, %v213_v49  ;;  %v231_v8 = vsub.f32 %v111_v54, %v215_v55 }
  0x34   :  { %v768_v24 = vpop.eup %767 }
  0x35   :  { %v308_v27 = vadd.f32 1.0, %v768_v24  ;;  %v770_v28 = vpop.eup %769  ;;  %v311_v37 = vmul.f32 -0.5, %v768_v24  ;;  %v314_v48 = vand.u32 2147483647, %v768_v24 }
  0x36   :  { %v772_v30 = vpop.eup %771  ;;  %v317_v31 = vadd.f32 1.0, %v770_v28  ;;  %v320_v39 = vmul.f32 -0.5, %v770_v28  ;;  %v323_v56 = vand.u32 2147483647, %v770_v28 }
  0x37   :  { %775 = vlog2.f32 %v308_v27  ;;  %v774_v32 = vpop.eup %773  ;;  %v326_v33 = vadd.f32 1.0, %v772_v30  ;;  %v329_v41 = vmul.f32 -0.5, %v772_v30  ;;  %v312_v44 = vadd.f32 1.0, %v311_v37 }
  0x38   :  { %777 = vlog2.f32 %v317_v31  ;;  %v335_v35 = vadd.f32 1.0, %v774_v32  ;;  %v338_v45 = vmul.f32 -0.5, %v774_v32  ;;  %v321_v51 = vadd.f32 1.0, %v320_v39 }
  0x39   :  { %779 = vlog2.f32 %v326_v33  ;;  %v330_v57 = vadd.f32 1.0, %v329_v41  ;;  %v313_v58 = vmul.f32 %v768_v24, %v312_v44  ;;  %v332_v59 = vand.u32 2147483647, %v772_v30 }
  0x3a   :  { %781 = vlog2.f32 %v335_v35  ;;  %v339_v60 = vadd.f32 1.0, %v338_v45  ;;  %vm906_vm2 = vcmp.lt.f32.partialorder %v314_v48, 0.0004427343  ;;  %v341_v1 = vand.u32 2147483647, %v774_v32 }
  0x3b   :  { %v322_v7 = vmul.f32 %v770_v28, %v321_v51  ;;  %vm911_vm3 = vcmp.lt.f32.partialorder %v323_v56, 0.0004427343  ;;  %v331_v10 = vmul.f32 %v772_v30, %v330_v57  ;;  %vm333_vm4 = vcmp.lt.f32.partialorder %v332_v59, 0.0004427343 }
  0x3c   :  { %v340_v15 = vmul.f32 %v774_v32, %v339_v60  ;;  %vm342_vm5 = vcmp.lt.f32.partialorder %v341_v1, 0.0004427343 }
  0x44   :  { %v776_v62 = vpop.eup %775 }
  0x45   :  { %v310_v6 = vmul.f32 0.6931472, %v776_v62  ;;  %v778_v3 = vpop.eup %777 }
  0x46   :  { %v780_v12 = vpop.eup %779  ;;  %v319_v14 = vmul.f32 0.6931472, %v778_v3 }
  0x47   :  { %v316_v13 = vsel %vm906_vm2, %v313_v58, %v310_v6  ;;  %v782_v16 = vpop.eup %781  ;;  %v328_v17 = vmul.f32 0.6931472, %v780_v12 }
  0x48   :  { %v452_v18 = vadd.f32 %v316_v13, %v228_v63  ;;  %v325_v20 = vsel %vm911_vm3, %v322_v7, %v319_v14  ;;  %v337_v21 = vmul.f32 0.6931472, %v782_v16 }
  0x49   :  { %v334_v23 = vsel %vm333_vm4, %v331_v10, %v328_v17  ;;  %v453_v24 = vadd.f32 %v325_v20, %v229_v4 }
  0x4a   :  { %v572_v27 = vmul.f32 %v498_v2, %v452_v18  ;;  %v343_v28 = vsel %vm342_vm5, %v340_v15, %v337_v21  ;;  %v454_v29 = vadd.f32 %v334_v23, %v230_v5 }
  0x4b   :  { %v455_v30 = vadd.f32 %v343_v28, %v231_v8  ;;  %v573_v31 = vmul.f32 %v499_v19, %v453_v24 }
  0x4c   :  { %v574_v33 = vmul.f32 %v506_v11, %v454_v29 }
  0x4d   :  { %v575_v34 = vmul.f32 %v507_v25, %v455_v30  ;;  %v619_v32 = vcombine.low %v572_v27, %v573_v31 }
  0x4f   :  { %v620_v35 = vcombine.low %v574_v33, %v575_v34  ;;  %v627_v36 = vrot.slane %v619_v32, %v894_v26 }
  0x51   :  { %v634_v37 = vrot.slane %v620_v35, %v894_v26 }
  0x53   :  { %v635_v38 = vcombine.low %v627_v36, %v634_v37  ;;  %v636_v39 = vcombine.high %v627_v36, %v634_v37 }
  0x55   :  { %v699_v40 = vsel %vm599_vm6, %v635_v38, 0.0  ;;  %v700_v41 = vsel %vm599_vm6, %v636_v39, 0.0 }
  0x56   :  { %v707_v42 = vadd.f32 %v700_v41, %v699_v40 }
  0x58   :  { %733 = vst [vmem:[#allocation8] sm:$0xff] %v707_v42 }
  0x59   :  { %834 = shalt.err (!%p831_p0)
}
  0x5a   :  { %743 = dma.vmem_to_hbm [thread:$0]  %s741_s1, 128, %s928_s2, [#allocation5]  }
  0x5b   :  { %847 = dma.done.wait [#allocation5], 128  }
  0x5c   :  { %848 = vsyncadd [#allocation5], 4294967168 }
  0x5d   :  { %747 = vsyncpa [#allocation4], 1 }
  0x5e   :  { %748 = vsyncpa [#allocation7], 1 }
  0x5f   :  { %749 = vsyncpa [#allocation5], 1 }

</bundles_post_ra>
